<compile_context>
chip_gen: v7x
topology: tpu7x:2x2x1
jax: 0.10.0
libtpu: 0.0.40
codegen_flags: <defaults>
</compile_context>

<pallas_src>
import functools

import jax
import jax.numpy as jnp
from jax.experimental import pallas as pl
from jax.experimental.pallas import tpu as pltpu

D_IN, H1, H2, H3, D_OUT = 768, 512, 256, 128, 4
D_OUT_PAD = 128  # lane-dense padded output width


def _round_up(x, m):
    return ((x + m - 1) // m) * m


def fcnn_kernel(x_ref, w1_ref, b1_ref, w2_ref, b2_ref,
                w3_ref, b3_ref, w4_ref, b4_ref, o_ref):
    # x tile: (TB, 768) bf16; weights bf16; biases f32; all resident in VMEM.
    x = x_ref[...]
    h = jnp.dot(x, w1_ref[...], preferred_element_type=jnp.float32) + b1_ref[...]
    h = jnp.maximum(h, 0.0)
    h = jnp.dot(h.astype(jnp.bfloat16), w2_ref[...],
                preferred_element_type=jnp.float32) + b2_ref[...]
    h = jnp.maximum(h, 0.0)
    h = jnp.dot(h.astype(jnp.bfloat16), w3_ref[...],
                preferred_element_type=jnp.float32) + b3_ref[...]
    h = jnp.maximum(h, 0.0)
    h = jnp.dot(h.astype(jnp.bfloat16), w4_ref[...],
                preferred_element_type=jnp.float32) + b4_ref[...]
    o_ref[...] = h.astype(o_ref.dtype)  # (TB, 128) lane-dense f32 store


@functools.partial(jax.jit, static_argnames=("tb",))
def fcnn_forward(x, params, *, tb=256):
    """x: (B, 768) float32. params: w1..w4 as (in, out), b1..b4 as (1, out), all f32."""
    B = x.shape[0]
    # Batch tile: multiple of 8 (f32/bf16 sublane), capped at `tb`.
    tile = min(tb, _round_up(max(B, 1), 8))
    B_pad = _round_up(B, tile)
    n_tiles = B_pad // tile

    # bf16 matmul inputs; biases stay f32 (accumulation/elementwise in f32).
    x_p = jnp.pad(x.astype(jnp.bfloat16), ((0, B_pad - B), (0, 0)))
    w1 = params["w1"].astype(jnp.bfloat16)
    w2 = params["w2"].astype(jnp.bfloat16)
    w3 = params["w3"].astype(jnp.bfloat16)
    # Pad final layer to 128 output lanes (zero columns) for a lane-dense store.
    w4 = jnp.pad(params["w4"].astype(jnp.bfloat16),
                 ((0, 0), (0, D_OUT_PAD - D_OUT)))
    b4 = jnp.pad(params["b4"], ((0, 0), (0, D_OUT_PAD - D_OUT)))
    b1, b2, b3 = params["b1"], params["b2"], params["b3"]

    # Weights/biases: constant index_map -> fetched once, VMEM-resident across tiles.
    const = lambda shape: pl.BlockSpec(shape, lambda i: (0,) * len(shape))

    out = pl.pallas_call(
        fcnn_kernel,
        out_shape=jax.ShapeDtypeStruct((B_pad, D_OUT_PAD), jnp.float32),
        grid_spec=pltpu.PrefetchScalarGridSpec(
            num_scalar_prefetch=0,
            grid=(n_tiles,),
            in_specs=[
                pl.BlockSpec((tile, D_IN), lambda i: (i, 0)),   # x: tiled over batch
                const((D_IN, H1)), const((1, H1)),
                const((H1, H2)), const((1, H2)),
                const((H2, H3)), const((1, H3)),
                const((H3, D_OUT_PAD)), const((1, D_OUT_PAD)),
            ],
            out_specs=pl.BlockSpec((tile, D_OUT_PAD), lambda i: (i, 0)),
        ),
        compiler_params=pltpu.CompilerParams(
            dimension_semantics=("parallel",),   # megacore batch split on v7x
            vmem_limit_bytes=32 << 20,
        ),
    )(x_p, w1, b1, w2, b2, w3, b3, w4, b4)

    return out[:B, :D_OUT]


def init_params(key):
    """Deterministic init mimicking PyTorch nn.Linear default U(-1/sqrt(fan_in), +)."""
    dims = [(D_IN, H1), (H1, H2), (H2, H3), (H3, D_OUT)]
    params = {}
    for i, (fan_in, fan_out) in enumerate(dims, start=1):
        key, kw, kb = jax.random.split(key, 3)
        bound = 1.0 / jnp.sqrt(fan_in)
        # Stored as (in, out): transpose of PyTorch's (out, in) weight.
        params[f"w{i}"] = jax.random.uniform(
            kw, (fan_in, fan_out), jnp.float32, -bound, bound)
        params[f"b{i}"] = jax.random.uniform(
            kb, (1, fan_out), jnp.float32, -bound, bound)
    return params


def fcnn_ref(x, params):
    """Pure-JAX reference mirroring the kernel's bf16-in / f32-accumulate numerics."""
    bf = lambda a: a.astype(jnp.bfloat16)
    h = jnp.dot(bf(x), bf(params["w1"]),
                preferred_element_type=jnp.float32) + params["b1"]
    h = jnp.maximum(h, 0.0)
    h = jnp.dot(bf(h), bf(params["w2"]),
                preferred_element_type=jnp.float32) + params["b2"]
    h = jnp.maximum(h, 0.0)
    h = jnp.dot(bf(h), bf(params["w3"]),
                preferred_element_type=jnp.float32) + params["b3"]
    h = jnp.maximum(h, 0.0)
    h = jnp.dot(bf(h), bf(params["w4"]),
                preferred_element_type=jnp.float32) + params["b4"]
    return h


if __name__ == "__main__":
    key = jax.random.PRNGKey(0)
    kx, kp = jax.random.split(key)
    B = 8
    x = jax.random.normal(kx, (B, D_IN), jnp.float32)
    params = init_params(kp)

    out = fcnn_forward(x, params)
    out = jax.block_until_ready(out)

    ref = fcnn_ref(x, params)
    assert out.shape == (B, D_OUT), f"bad output shape {out.shape}"
    assert jnp.allclose(out, ref, atol=1e-2, rtol=1e-2), "mismatch vs pure-JAX reference"
    # TODO(synk): get_embed() (stop after fc3, no final ReLU/fc4) not exposed; forward() only.
    print("KERNEL_OK")
</pallas_src>

<mosaic_0001>
module attributes {stable_mosaic.version = 11 : i64} {
  func.func @fcnn_kernel(%arg0: i32, %arg1: memref<8x768xbf16, #tpu.memory_space<vmem>>, %arg2: memref<768x512xbf16, #tpu.memory_space<vmem>>, %arg3: memref<1x512xf32, #tpu.memory_space<vmem>>, %arg4: memref<512x256xbf16, #tpu.memory_space<vmem>>, %arg5: memref<1x256xf32, #tpu.memory_space<vmem>>, %arg6: memref<256x128xbf16, #tpu.memory_space<vmem>>, %arg7: memref<1x128xf32, #tpu.memory_space<vmem>>, %arg8: memref<128x128xbf16, #tpu.memory_space<vmem>>, %arg9: memref<1x128xf32, #tpu.memory_space<vmem>>, %arg10: memref<8x128xf32, #tpu.memory_space<vmem>>) attributes {dimension_semantics = [#tpu.dimension_semantics<parallel>], iteration_bounds = array<i64: 1>, scalar_prefetch = 0 : i64, scratch_operands = 0 : i64, tpu.core_type = #tpu.core_type<tc>, window_params = [{transform_indices = @transform_0, window_bounds = array<i64: 8, 768>}, {pipeline_mode = #tpu.pipeline_mode<synchronous>, transform_indices = @transform_1, window_bounds = array<i64: 768, 512>}, {pipeline_mode = #tpu.pipeline_mode<synchronous>, transform_indices = @transform_2, window_bounds = array<i64: 1, 512>}, {pipeline_mode = #tpu.pipeline_mode<synchronous>, transform_indices = @transform_3, window_bounds = array<i64: 512, 256>}, {pipeline_mode = #tpu.pipeline_mode<synchronous>, transform_indices = @transform_4, window_bounds = array<i64: 1, 256>}, {pipeline_mode = #tpu.pipeline_mode<synchronous>, transform_indices = @transform_5, window_bounds = array<i64: 256, 128>}, {pipeline_mode = #tpu.pipeline_mode<synchronous>, transform_indices = @transform_6, window_bounds = array<i64: 1, 128>}, {pipeline_mode = #tpu.pipeline_mode<synchronous>, transform_indices = @transform_7, window_bounds = array<i64: 128, 128>}, {pipeline_mode = #tpu.pipeline_mode<synchronous>, transform_indices = @transform_8, window_bounds = array<i64: 1, 128>}, {transform_indices = @transform_9, window_bounds = array<i64: 8, 128>}]} {
    %c0 = arith.constant 0 : index
    %c0_0 = arith.constant 0 : index
    %0 = vector.load %arg1[%c0, %c0_0] : memref<8x768xbf16, #tpu.memory_space<vmem>>, vector<8x768xbf16>
    %c0_1 = arith.constant 0 : index
    %c0_2 = arith.constant 0 : index
    %1 = vector.load %arg2[%c0_1, %c0_2] : memref<768x512xbf16, #tpu.memory_space<vmem>>, vector<768x512xbf16>
    %cst = arith.constant dense<0.000000e+00> : vector<8x512xf32>
    %2 = tpu.matmul %0, %1, %cst {dimension_numbers = #tpu.dot_dimension_numbers<[1], [0], [0], [1], [0, 0, 1, 1], [], []>} : vector<8x768xbf16>, vector<768x512xbf16>, vector<8x512xf32> -> vector<8x512xf32>
    %c0_3 = arith.constant 0 : index
    %c0_4 = arith.constant 0 : index
    %3 = vector.load %arg3[%c0_3, %c0_4] : memref<1x512xf32, #tpu.memory_space<vmem>>, vector<1x512xf32>
    %4 = vector.broadcast %3 : vector<1x512xf32> to vector<8x512xf32>
    %5 = arith.addf %2, %4 : vector<8x512xf32>
    %cst_5 = arith.constant 0.000000e+00 : f32
    %6 = vector.broadcast %cst_5 : f32 to vector<8x512xf32>
    %7 = arith.maximumf %5, %6 : vector<8x512xf32>
    %8 = arith.truncf %7 : vector<8x512xf32> to vector<8x512xbf16>
    %c0_6 = arith.constant 0 : index
    %c0_7 = arith.constant 0 : index
    %9 = vector.load %arg4[%c0_6, %c0_7] : memref<512x256xbf16, #tpu.memory_space<vmem>>, vector<512x256xbf16>
    %cst_8 = arith.constant dense<0.000000e+00> : vector<8x256xf32>
    %10 = tpu.matmul %8, %9, %cst_8 {dimension_numbers = #tpu.dot_dimension_numbers<[1], [0], [0], [1], [0, 0, 1, 1], [], []>} : vector<8x512xbf16>, vector<512x256xbf16>, vector<8x256xf32> -> vector<8x256xf32>
    %c0_9 = arith.constant 0 : index
    %c0_10 = arith.constant 0 : index
    %11 = vector.load %arg5[%c0_9, %c0_10] : memref<1x256xf32, #tpu.memory_space<vmem>>, vector<1x256xf32>
    %12 = vector.broadcast %11 : vector<1x256xf32> to vector<8x256xf32>
    %13 = arith.addf %10, %12 : vector<8x256xf32>
    %cst_11 = arith.constant 0.000000e+00 : f32
    %14 = vector.broadcast %cst_11 : f32 to vector<8x256xf32>
    %15 = arith.maximumf %13, %14 : vector<8x256xf32>
    %16 = arith.truncf %15 : vector<8x256xf32> to vector<8x256xbf16>
    %c0_12 = arith.constant 0 : index
    %c0_13 = arith.constant 0 : index
    %17 = vector.load %arg6[%c0_12, %c0_13] : memref<256x128xbf16, #tpu.memory_space<vmem>>, vector<256x128xbf16>
    %cst_14 = arith.constant dense<0.000000e+00> : vector<8x128xf32>
    %18 = tpu.matmul %16, %17, %cst_14 {dimension_numbers = #tpu.dot_dimension_numbers<[1], [0], [0], [1], [0, 0, 1, 1], [], []>} : vector<8x256xbf16>, vector<256x128xbf16>, vector<8x128xf32> -> vector<8x128xf32>
    %c0_15 = arith.constant 0 : index
    %c0_16 = arith.constant 0 : index
    %19 = vector.load %arg7[%c0_15, %c0_16] : memref<1x128xf32, #tpu.memory_space<vmem>>, vector<1x128xf32>
    %20 = vector.broadcast %19 : vector<1x128xf32> to vector<8x128xf32>
    %21 = arith.addf %18, %20 : vector<8x128xf32>
    %cst_17 = arith.constant 0.000000e+00 : f32
    %22 = vector.broadcast %cst_17 : f32 to vector<8x128xf32>
    %23 = arith.maximumf %21, %22 : vector<8x128xf32>
    %24 = arith.truncf %23 : vector<8x128xf32> to vector<8x128xbf16>
    %c0_18 = arith.constant 0 : index
    %c0_19 = arith.constant 0 : index
    %25 = vector.load %arg8[%c0_18, %c0_19] : memref<128x128xbf16, #tpu.memory_space<vmem>>, vector<128x128xbf16>
    %cst_20 = arith.constant dense<0.000000e+00> : vector<8x128xf32>
    %26 = tpu.matmul %24, %25, %cst_20 {dimension_numbers = #tpu.dot_dimension_numbers<[1], [0], [0], [1], [0, 0, 1, 1], [], []>} : vector<8x128xbf16>, vector<128x128xbf16>, vector<8x128xf32> -> vector<8x128xf32>
    %c0_21 = arith.constant 0 : index
    %c0_22 = arith.constant 0 : index
    %27 = vector.load %arg9[%c0_21, %c0_22] : memref<1x128xf32, #tpu.memory_space<vmem>>, vector<1x128xf32>
    %28 = vector.broadcast %27 : vector<1x128xf32> to vector<8x128xf32>
    %29 = arith.addf %26, %28 : vector<8x128xf32>
    %c0_23 = arith.constant 0 : index
    %c0_24 = arith.constant 0 : index
    %30 = vector.load %arg10[%c0_23, %c0_24] : memref<8x128xf32, #tpu.memory_space<vmem>>, vector<8x128xf32>
    tpu.vector_store %arg10[%c0_23, %c0_24], %29 {strides = array<i32>} : memref<8x128xf32, #tpu.memory_space<vmem>>, vector<8x128xf32>,
    return
  }
  func.func @transform_0(%arg0: i32) -> (i32, i32) {
    %c0_i32 = arith.constant 0 : i32
    %c0_i32_0 = arith.constant 0 : i32
    return %arg0, %c0_i32 : i32, i32
  }
  func.func @transform_1(%arg0: i32) -> (i32, i32) {
    %c0_i32 = arith.constant 0 : i32
    %c0_i32_0 = arith.constant 0 : i32
    %c0_i32_1 = arith.constant 0 : i32
    return %c0_i32, %c0_i32_0 : i32, i32
  }
  func.func @transform_2(%arg0: i32) -> (i32, i32) {
    %c0_i32 = arith.constant 0 : i32
    %c0_i32_0 = arith.constant 0 : i32
    %c0_i32_1 = arith.constant 0 : i32
    return %c0_i32, %c0_i32_0 : i32, i32
  }
  func.func @transform_3(%arg0: i32) -> (i32, i32) {
    %c0_i32 = arith.constant 0 : i32
    %c0_i32_0 = arith.constant 0 : i32
    %c0_i32_1 = arith.constant 0 : i32
    return %c0_i32, %c0_i32_0 : i32, i32
  }
  func.func @transform_4(%arg0: i32) -> (i32, i32) {
    %c0_i32 = arith.constant 0 : i32
    %c0_i32_0 = arith.constant 0 : i32
    %c0_i32_1 = arith.constant 0 : i32
    return %c0_i32, %c0_i32_0 : i32, i32
  }
  func.func @transform_5(%arg0: i32) -> (i32, i32) {
    %c0_i32 = arith.constant 0 : i32
    %c0_i32_0 = arith.constant 0 : i32
    %c0_i32_1 = arith.constant 0 : i32
    return %c0_i32, %c0_i32_0 : i32, i32
  }
  func.func @transform_6(%arg0: i32) -> (i32, i32) {
    %c0_i32 = arith.constant 0 : i32
    %c0_i32_0 = arith.constant 0 : i32
    %c0_i32_1 = arith.constant 0 : i32
    return %c0_i32, %c0_i32_0 : i32, i32
  }
  func.func @transform_7(%arg0: i32) -> (i32, i32) {
    %c0_i32 = arith.constant 0 : i32
    %c0_i32_0 = arith.constant 0 : i32
    %c0_i32_1 = arith.constant 0 : i32
    return %c0_i32, %c0_i32_0 : i32, i32
  }
  func.func @transform_8(%arg0: i32) -> (i32, i32) {
    %c0_i32 = arith.constant 0 : i32
    %c0_i32_0 = arith.constant 0 : i32
    %c0_i32_1 = arith.constant 0 : i32
    return %c0_i32, %c0_i32_0 : i32, i32
  }
  func.func @transform_9(%arg0: i32) -> (i32, i32) {
    %c0_i32 = arith.constant 0 : i32
    %c0_i32_0 = arith.constant 0 : i32
    return %arg0, %c0_i32 : i32, i32
  }
}

</mosaic_0001>

<bundles_post_ra>
// kernel: fcnn_forward.1
= control target key start
LH: loop header
LB: loop body
LE: loop exit
PB: predicated region body
PF: predicated region fallthrough
CT: control target
= control target key end

     0   :  { %vm3042_vm0 = vmmov 0   ;;  %s3992_s1 = inlined_call_operand.vmem [shape: bf16[768,512], index: 1, kind: input, shape index: {}]   ;;  %s3993_s0 = inlined_call_operand.vmem [shape: bf16[8,768], index: 0, kind: input, shape index: {}]   ;;  %s3994_s3 = inlined_call_operand.vmem [shape: bf16[512,256], index: 3, kind: input, shape index: {}]   ;;  %s3995_s5 = inlined_call_operand.vmem [shape: bf16[256,128], index: 5, kind: input, shape index: {}]   ;;  %s3996_s2 = inlined_call_operand.vmem [shape: f32[1,512], index: 2, kind: input, shape index: {}]   ;;  %s3997_s7 = inlined_call_operand.vmem [shape: bf16[128,128], index: 7, kind: input, shape index: {}]   ;;  %s3998_s4 = inlined_call_operand.vmem [shape: f32[1,256], index: 4, kind: input, shape index: {}]   ;;  %s3999_s6 = inlined_call_operand.vmem [shape: f32[1,128], index: 6, kind: input, shape index: {}]   ;;  %s4000_s8 = inlined_call_operand.vmem [shape: f32[1,128], index: 8, kind: input, shape index: {}]   ;;  %s4001_s9 = inlined_call_operand.vmem [shape: f32[8,128], index: 9, kind: output, shape index: {}]  }
   0x1   :  { %v2627_v0 = vld [vmem:[%s3992_s1 + $0x4] ss:$16 sps:$4 sm:$0xff]   ;;  %v2629_v1 = vld [vmem:[%s3992_s1 + $0xc] ss:$16 sps:$4 sm:$0xff]   ;;  %v2631_v2 = vld [vmem:[%s3992_s1] ss:$16 sps:$4 sm:$0xff]  }
   0x2   :  { %1231 = vmatprep.subr.bf16.mxu0 %v2627_v0  ;;  %v2632_v3 = vld [vmem:[%s3992_s1 + $0x8] ss:$16 sps:$4 sm:$0xff]   ;;  %1354 = vmatprep.subr.bf16.mxu1 %v2629_v1  ;;  %v2633_v4 = vld [vmem:[%s3992_s1 + $0x24] ss:$16 sps:$4 sm:$0xff]   ;;  %v2635_v5 = vld [vmem:[%s3992_s1 + $0x2c] ss:$16 sps:$4 sm:$0xff]  }
   0x3   :  { %1232 = vmatpush1.bf16.msra.mxu0 %v2631_v2  ;;  %1355 = vmatpush1.bf16.msra.mxu1 %v2632_v3  ;;  %v2637_v6 = vld [vmem:[%s3992_s1 + $0x20] ss:$16 sps:$4 sm:$0xff]   ;;  %v2638_v7 = vld [vmem:[%s3992_s1 + $0x28] ss:$16 sps:$4 sm:$0xff]   ;;  %v2639_v8 = vld [vmem:[%s3992_s1 + $0x44] ss:$16 sps:$4 sm:$0xff]  }
   0x4   :  { %1233 = vmatprep.subr.bf16.mxu0 %v2633_v4  ;;  %1356 = vmatprep.subr.bf16.mxu1 %v2635_v5  ;;  %v2641_v9 = vld [vmem:[%s3992_s1 + $0x4c] ss:$16 sps:$4 sm:$0xff]   ;;  %v2643_v10 = vld [vmem:[%s3992_s1 + $0x40] ss:$16 sps:$4 sm:$0xff]   ;;  %v2644_v11 = vld [vmem:[%s3992_s1 + $0x48] ss:$16 sps:$4 sm:$0xff]  }
   0x5   :  { %v2645_v12 = vld [vmem:[%s3992_s1 + $0x64] ss:$16 sps:$4 sm:$0xff]   ;;  %v2647_v13 = vld [vmem:[%s3992_s1 + $0x6c] ss:$16 sps:$4 sm:$0xff]   ;;  %v2649_v14 = vld [vmem:[%s3992_s1 + $0x60] ss:$16 sps:$4 sm:$0xff]  }
   0x6   :  { %v2650_v15 = vld [vmem:[%s3992_s1 + $0x68] ss:$16 sps:$4 sm:$0xff]   ;;  %v2651_v16 = vld [vmem:[%s3992_s1 + $0x84] ss:$16 sps:$4 sm:$0xff]   ;;  %v2653_v17 = vld [vmem:[%s3992_s1 + $0x8c] ss:$16 sps:$4 sm:$0xff]  }
   0x7   :  { %1234 = vmatpush1.bf16.msra.mxu0 %v2637_v6  ;;  %1357 = vmatpush1.bf16.msra.mxu1 %v2638_v7  ;;  %v2655_v18 = vld [vmem:[%s3992_s1 + $0x80] ss:$16 sps:$4 sm:$0xff]   ;;  %v2656_v19 = vld [vmem:[%s3992_s1 + $0x88] ss:$16 sps:$4 sm:$0xff]   ;;  %v2657_v20 = vld [vmem:[%s3992_s1 + $0xa4] ss:$16 sps:$4 sm:$0xff]  }
   0x8   :  { %1235 = vmatprep.subr.bf16.mxu0 %v2639_v8  ;;  %1358 = vmatprep.subr.bf16.mxu1 %v2641_v9  ;;  %v2659_v21 = vld [vmem:[%s3992_s1 + $0xac] ss:$16 sps:$4 sm:$0xff]   ;;  %v2661_v22 = vld [vmem:[%s3992_s1 + $0xa0] ss:$16 sps:$4 sm:$0xff]   ;;  %v2662_v23 = vld [vmem:[%s3992_s1 + $0xa8] ss:$16 sps:$4 sm:$0xff]  }
   0x9   :  { %v2663_v24 = vld [vmem:[%s3992_s1 + $0xc4] ss:$16 sps:$4 sm:$0xff]   ;;  %v2665_v25 = vld [vmem:[%s3992_s1 + $0xcc] ss:$16 sps:$4 sm:$0xff]   ;;  %v2667_v26 = vld [vmem:[%s3992_s1 + $0xc0] ss:$16 sps:$4 sm:$0xff]  }
   0xa   :  { %v2668_v27 = vld [vmem:[%s3992_s1 + $0xc8] ss:$16 sps:$4 sm:$0xff]   ;;  %v2669_v28 = vld [vmem:[%s3992_s1 + $0xe4] ss:$16 sps:$4 sm:$0xff]   ;;  %v2671_v29 = vld [vmem:[%s3992_s1 + $0xec] ss:$16 sps:$4 sm:$0xff]  }
   0xb   :  { %1236 = vmatpush1.bf16.msra.mxu0 %v2643_v10  ;;  %1359 = vmatpush1.bf16.msra.mxu1 %v2644_v11  ;;  %v2673_v30 = vld [vmem:[%s3992_s1 + $0xe0] ss:$16 sps:$4 sm:$0xff]   ;;  %v2674_v31 = vld [vmem:[%s3992_s1 + $0xe8] ss:$16 sps:$4 sm:$0xff]   ;;  %v2675_v32 = vld [vmem:[%s3992_s1 + $0x104] ss:$16 sps:$4 sm:$0xff]  }
   0xc   :  { %1237 = vmatprep.subr.bf16.mxu0 %v2645_v12  ;;  %1360 = vmatprep.subr.bf16.mxu1 %v2647_v13  ;;  %v2677_v33 = vld [vmem:[%s3992_s1 + $0x10c] ss:$16 sps:$4 sm:$0xff]   ;;  %v2679_v34 = vld [vmem:[%s3992_s1 + $0x100] ss:$16 sps:$4 sm:$0xff]   ;;  %v2680_v35 = vld [vmem:[%s3992_s1 + $0x108] ss:$16 sps:$4 sm:$0xff]  }
   0xd   :  { %v2681_v36 = vld [vmem:[%s3992_s1 + $0x124] ss:$16 sps:$4 sm:$0xff]   ;;  %v2683_v37 = vld [vmem:[%s3992_s1 + $0x12c] ss:$16 sps:$4 sm:$0xff]   ;;  %v2685_v38 = vld [vmem:[%s3992_s1 + $0x120] ss:$16 sps:$4 sm:$0xff]  }
   0xe   :  { %v2686_v39 = vld [vmem:[%s3992_s1 + $0x128] ss:$16 sps:$4 sm:$0xff]   ;;  %v2687_v40 = vld [vmem:[%s3992_s1 + $0x144] ss:$16 sps:$4 sm:$0xff]   ;;  %v2689_v41 = vld [vmem:[%s3992_s1 + $0x14c] ss:$16 sps:$4 sm:$0xff]  }
   0xf   :  { %1238 = vmatpush1.bf16.msra.mxu0 %v2649_v14  ;;  %1361 = vmatpush1.bf16.msra.mxu1 %v2650_v15  ;;  %v2691_v42 = vld [vmem:[%s3992_s1 + $0x140] ss:$16 sps:$4 sm:$0xff]   ;;  %v2692_v43 = vld [vmem:[%s3992_s1 + $0x148] ss:$16 sps:$4 sm:$0xff]   ;;  %v2693_v44 = vld [vmem:[%s3992_s1 + $0x164] ss:$16 sps:$4 sm:$0xff]  }
  0x10   :  { %1239 = vmatprep.subr.bf16.mxu0 %v2651_v16  ;;  %1362 = vmatprep.subr.bf16.mxu1 %v2653_v17  ;;  %v2695_v45 = vld [vmem:[%s3992_s1 + $0x16c] ss:$16 sps:$4 sm:$0xff]   ;;  %v33_v46 = vld [vmem:[%s3993_s0] sm:$0xff]  ;;  %v2698_v49 = vld [vmem:[%s3992_s1 + $0x168] ss:$16 sps:$4 sm:$0xff]  }
  0x11   :  { %v2697_v47 = vld [vmem:[%s3992_s1 + $0x160] ss:$16 sps:$4 sm:$0xff]   ;;  %v2261_v48 = vcombine.high %v33_v46, %v33_v46  ;;  %v2699_v50 = vld [vmem:[%s3992_s1 + $0x184] ss:$16 sps:$4 sm:$0xff]   ;;  %v2701_v51 = vld [vmem:[%s3992_s1 + $0x18c] ss:$16 sps:$4 sm:$0xff]   ;;  %v2260_v4 = vcombine.low %v33_v46, %v33_v46 }
  0x12   :  { %v2703_v52 = vld [vmem:[%s3992_s1 + $0x180] ss:$16 sps:$4 sm:$0xff]   ;;  %v2704_v53 = vld [vmem:[%s3992_s1 + $0x188] ss:$16 sps:$4 sm:$0xff]   ;;  %v2705_v54 = vld [vmem:[%s3992_s1 + $0x1a4] ss:$16 sps:$4 sm:$0xff]  }
  0x13   :  { %1240 = vmatpush1.bf16.msra.mxu0 %v2655_v18  ;;  %1363 = vmatpush1.bf16.msra.mxu1 %v2656_v19  ;;  %v2707_v55 = vld [vmem:[%s3992_s1 + $0x1ac] ss:$16 sps:$4 sm:$0xff]   ;;  %v2709_v56 = vld [vmem:[%s3992_s1 + $0x1a0] ss:$16 sps:$4 sm:$0xff]   ;;  %v2710_v57 = vld [vmem:[%s3992_s1 + $0x1a8] ss:$16 sps:$4 sm:$0xff]  }
  0x14   :  { %1241 = vmatprep.subr.bf16.mxu0 %v2657_v20  ;;  %1364 = vmatprep.subr.bf16.mxu1 %v2659_v21  ;;  %v2711_v58 = vld [vmem:[%s3992_s1 + $0x1c4] ss:$16 sps:$4 sm:$0xff]   ;;  %v2713_v59 = vld [vmem:[%s3992_s1 + $0x1cc] ss:$16 sps:$4 sm:$0xff]   ;;  %v2715_v60 = vld [vmem:[%s3992_s1 + $0x1c0] ss:$16 sps:$4 sm:$0xff]  }
  0x15   :  { %1263 = vmatprep.mubr.bf16.mxu0 %v2261_v48  ;;  %1386 = vmatprep.mubr.bf16.mxu1 %v2261_v48  ;;  %v2716_v61 = vld [vmem:[%s3992_s1 + $0x1c8] ss:$16 sps:$4 sm:$0xff]   ;;  %v2717_v62 = vld [vmem:[%s3992_s1 + $0x1e4] ss:$16 sps:$4 sm:$0xff]   ;;  %v2719_v63 = vld [vmem:[%s3992_s1 + $0x1ec] ss:$16 sps:$4 sm:$0xff]  }
  0x16   :  { %v2721_v0 = vld [vmem:[%s3992_s1 + $0x1e0] ss:$16 sps:$4 sm:$0xff]   ;;  %v2722_v1 = vld [vmem:[%s3992_s1 + $0x1e8] ss:$16 sps:$4 sm:$0xff]   ;;  %v2727_v2 = vld [vmem:[%s3992_s1 + $0x204] ss:$16 sps:$4 sm:$0xff]  }
  0x17   :  { %1242 = vmatpush1.bf16.msra.mxu0 %v2661_v22  ;;  %1365 = vmatpush1.bf16.msra.mxu1 %v2662_v23  ;;  %v2730_v3 = vld [vmem:[%s3992_s1 + $0x20c] ss:$16 sps:$4 sm:$0xff]   ;;  %v2725_v5 = vld [vmem:[%s3992_s1 + $0x200] ss:$16 sps:$4 sm:$0xff]   ;;  %v2728_v6 = vld [vmem:[%s3992_s1 + $0x208] ss:$16 sps:$4 sm:$0xff]  }
  0x18   :  { %1243 = vmatprep.subr.bf16.mxu0 %v2663_v24  ;;  %1366 = vmatprep.subr.bf16.mxu1 %v2665_v25  ;;  %v2733_v7 = vld [vmem:[%s3992_s1 + $0x224] ss:$16 sps:$4 sm:$0xff]   ;;  %v2736_v8 = vld [vmem:[%s3992_s1 + $0x22c] ss:$16 sps:$4 sm:$0xff]   ;;  %v2731_v9 = vld [vmem:[%s3992_s1 + $0x220] ss:$16 sps:$4 sm:$0xff]  }
  0x19   :  { %v2734_v10 = vld [vmem:[%s3992_s1 + $0x228] ss:$16 sps:$4 sm:$0xff]   ;;  %v2739_v11 = vld [vmem:[%s3992_s1 + $0x244] ss:$16 sps:$4 sm:$0xff]   ;;  %v2742_v12 = vld [vmem:[%s3992_s1 + $0x24c] ss:$16 sps:$4 sm:$0xff]  }
  0x1a   :  { %v2737_v13 = vld [vmem:[%s3992_s1 + $0x240] ss:$16 sps:$4 sm:$0xff]   ;;  %v2740_v14 = vld [vmem:[%s3992_s1 + $0x248] ss:$16 sps:$4 sm:$0xff]   ;;  %v2745_v15 = vld [vmem:[%s3992_s1 + $0x264] ss:$16 sps:$4 sm:$0xff]  }
  0x1b   :  { %1244 = vmatpush1.bf16.msra.mxu0 %v2667_v26  ;;  %1367 = vmatpush1.bf16.msra.mxu1 %v2668_v27  ;;  %v2748_v16 = vld [vmem:[%s3992_s1 + $0x26c] ss:$16 sps:$4 sm:$0xff]   ;;  %v2743_v17 = vld [vmem:[%s3992_s1 + $0x260] ss:$16 sps:$4 sm:$0xff]   ;;  %v2746_v18 = vld [vmem:[%s3992_s1 + $0x268] ss:$16 sps:$4 sm:$0xff]  }
  0x1c   :  { %1245 = vmatprep.subr.bf16.mxu0 %v2669_v28  ;;  %1368 = vmatprep.subr.bf16.mxu1 %v2671_v29  ;;  %v2751_v19 = vld [vmem:[%s3992_s1 + $0x284] ss:$16 sps:$4 sm:$0xff]   ;;  %v2754_v20 = vld [vmem:[%s3992_s1 + $0x28c] ss:$16 sps:$4 sm:$0xff]   ;;  %v2749_v21 = vld [vmem:[%s3992_s1 + $0x280] ss:$16 sps:$4 sm:$0xff]  }
  0x1d   :  { %v2752_v22 = vld [vmem:[%s3992_s1 + $0x288] ss:$16 sps:$4 sm:$0xff]   ;;  %v2757_v23 = vld [vmem:[%s3992_s1 + $0x2a4] ss:$16 sps:$4 sm:$0xff]   ;;  %v2760_v24 = vld [vmem:[%s3992_s1 + $0x2ac] ss:$16 sps:$4 sm:$0xff]  }
  0x1e   :  { %v2755_v25 = vld [vmem:[%s3992_s1 + $0x2a0] ss:$16 sps:$4 sm:$0xff]   ;;  %v2758_v26 = vld [vmem:[%s3992_s1 + $0x2a8] ss:$16 sps:$4 sm:$0xff]   ;;  %v2763_v27 = vld [vmem:[%s3992_s1 + $0x2c4] ss:$16 sps:$4 sm:$0xff]  }
  0x1f   :  { %1246 = vmatpush1.bf16.msra.mxu0 %v2673_v30  ;;  %1369 = vmatpush1.bf16.msra.mxu1 %v2674_v31  ;;  %v2766_v28 = vld [vmem:[%s3992_s1 + $0x2cc] ss:$16 sps:$4 sm:$0xff]   ;;  %v2761_v31 = vld [vmem:[%s3992_s1 + $0x2c0] ss:$16 sps:$4 sm:$0xff]   ;;  %v2788_v48 = vld [vmem:[%s3992_s1 + $0x348] ss:$16 sps:$4 sm:$0xff]  }
  0x20   :  { %1247 = vmatprep.subr.bf16.mxu0 %v2675_v32  ;;  %1370 = vmatprep.subr.bf16.mxu1 %v2677_v33  ;;  %v3369_v29 = vld [vmem:[%s3993_s0 + $0x8] sm:$0xff]  ;;  %v2769_v33 = vld [vmem:[%s3992_s1 + $0x2e4] ss:$16 sps:$4 sm:$0xff]  }
  0x21   :  { %v2263_v30 = vcombine.high %v3369_v29, %v3369_v29  ;;  %v2764_v32 = vld [vmem:[%s3992_s1 + $0x2c8] ss:$16 sps:$4 sm:$0xff]   ;;  %v2790_v46 = vld [vmem:[%s3992_s1 + $0x34c] ss:$16 sps:$4 sm:$0xff]  }
  0x23   :  { %1248 = vmatpush1.bf16.msra.mxu0 %v2679_v34  ;;  %1371 = vmatpush1.bf16.msra.mxu1 %v2680_v35  ;;  %v2772_v34 = vld [vmem:[%s3992_s1 + $0x2ec] ss:$16 sps:$4 sm:$0xff]   ;;  %v2767_v35 = vld [vmem:[%s3992_s1 + $0x2e0] ss:$16 sps:$4 sm:$0xff]  }
  0x24   :  { %1249 = vmatprep.subr.bf16.mxu0 %v2681_v36  ;;  %1372 = vmatprep.subr.bf16.mxu1 %v2683_v37  ;;  %v2770_v36 = vld [vmem:[%s3992_s1 + $0x2e8] ss:$16 sps:$4 sm:$0xff]   ;;  %v2775_v37 = vld [vmem:[%s3992_s1 + $0x304] ss:$16 sps:$4 sm:$0xff]  }
  0x27   :  { %1250 = vmatpush1.bf16.msra.mxu0 %v2685_v38  ;;  %1373 = vmatpush1.bf16.msra.mxu1 %v2686_v39  ;;  %v2778_v38 = vld [vmem:[%s3992_s1 + $0x30c] ss:$16 sps:$4 sm:$0xff]   ;;  %v2773_v39 = vld [vmem:[%s3992_s1 + $0x300] ss:$16 sps:$4 sm:$0xff]  }
  0x28   :  { %1251 = vmatprep.subr.bf16.mxu0 %v2687_v40  ;;  %1374 = vmatprep.subr.bf16.mxu1 %v2689_v41  ;;  %v2776_v40 = vld [vmem:[%s3992_s1 + $0x308] ss:$16 sps:$4 sm:$0xff]   ;;  %v2781_v41 = vld [vmem:[%s3992_s1 + $0x324] ss:$16 sps:$4 sm:$0xff]  }
  0x2b   :  { %1252 = vmatpush1.bf16.msra.mxu0 %v2691_v42  ;;  %1375 = vmatpush1.bf16.msra.mxu1 %v2692_v43  ;;  %v2784_v42 = vld [vmem:[%s3992_s1 + $0x32c] ss:$16 sps:$4 sm:$0xff]   ;;  %v2779_v43 = vld [vmem:[%s3992_s1 + $0x320] ss:$16 sps:$4 sm:$0xff]  }
  0x2c   :  { %1253 = vmatprep.subr.bf16.mxu0 %v2693_v44  ;;  %1376 = vmatprep.subr.bf16.mxu1 %v2695_v45  ;;  %v2782_v44 = vld [vmem:[%s3992_s1 + $0x328] ss:$16 sps:$4 sm:$0xff]   ;;  %v2787_v45 = vld [vmem:[%s3992_s1 + $0x344] ss:$16 sps:$4 sm:$0xff]  }
  0x2f   :  { %1254 = vmatpush1.bf16.msra.mxu0 %v2697_v47  ;;  %1377 = vmatpush1.bf16.msra.mxu1 %v2698_v49  ;;  %v2785_v47 = vld [vmem:[%s3992_s1 + $0x340] ss:$16 sps:$4 sm:$0xff]   ;;  %v2793_v49 = vld [vmem:[%s3992_s1 + $0x364] ss:$16 sps:$4 sm:$0xff]  }
  0x30   :  { %1255 = vmatprep.subr.bf16.mxu0 %v2699_v50  ;;  %1378 = vmatprep.subr.bf16.mxu1 %v2701_v51  ;;  %v2796_v50 = vld [vmem:[%s3992_s1 + $0x36c] ss:$16 sps:$4 sm:$0xff]   ;;  %v2791_v51 = vld [vmem:[%s3992_s1 + $0x360] ss:$16 sps:$4 sm:$0xff]  }
  0x33   :  { %1256 = vmatpush1.bf16.msra.mxu0 %v2703_v52  ;;  %1379 = vmatpush1.bf16.msra.mxu1 %v2704_v53  ;;  %v2794_v52 = vld [vmem:[%s3992_s1 + $0x368] ss:$16 sps:$4 sm:$0xff]   ;;  %v2799_v53 = vld [vmem:[%s3992_s1 + $0x384] ss:$16 sps:$4 sm:$0xff]  }
  0x34   :  { %1257 = vmatprep.subr.bf16.mxu0 %v2705_v54  ;;  %1380 = vmatprep.subr.bf16.mxu1 %v2707_v55  ;;  %v2802_v54 = vld [vmem:[%s3992_s1 + $0x38c] ss:$16 sps:$4 sm:$0xff]   ;;  %v2797_v55 = vld [vmem:[%s3992_s1 + $0x380] ss:$16 sps:$4 sm:$0xff]  }
  0x37   :  { %1258 = vmatpush1.bf16.msra.mxu0 %v2709_v56  ;;  %1381 = vmatpush1.bf16.msra.mxu1 %v2710_v57  ;;  %v2800_v56 = vld [vmem:[%s3992_s1 + $0x388] ss:$16 sps:$4 sm:$0xff]   ;;  %v2805_v57 = vld [vmem:[%s3992_s1 + $0x3a4] ss:$16 sps:$4 sm:$0xff]  }
  0x38   :  { %1259 = vmatprep.subr.bf16.mxu0 %v2711_v58  ;;  %1382 = vmatprep.subr.bf16.mxu1 %v2713_v59  ;;  %v2808_v58 = vld [vmem:[%s3992_s1 + $0x3ac] ss:$16 sps:$4 sm:$0xff]   ;;  %v2803_v59 = vld [vmem:[%s3992_s1 + $0x3a0] ss:$16 sps:$4 sm:$0xff]  }
  0x3b   :  { %1260 = vmatpush1.bf16.msra.mxu0 %v2715_v60  ;;  %1383 = vmatpush1.bf16.msra.mxu1 %v2716_v61  ;;  %v2806_v60 = vld [vmem:[%s3992_s1 + $0x3a8] ss:$16 sps:$4 sm:$0xff]   ;;  %v2811_v61 = vld [vmem:[%s3992_s1 + $0x3c4] ss:$16 sps:$4 sm:$0xff]  }
  0x3c   :  { %1261 = vmatprep.subr.bf16.mxu0 %v2717_v62  ;;  %1384 = vmatprep.subr.bf16.mxu1 %v2719_v63  ;;  %v2814_v62 = vld [vmem:[%s3992_s1 + $0x3cc] ss:$16 sps:$4 sm:$0xff]   ;;  %v2809_v63 = vld [vmem:[%s3992_s1 + $0x3c0] ss:$16 sps:$4 sm:$0xff]  }
  0x3f   :  { %1262 = vmatpush1.bf16.msra.mxu0 %v2721_v0  ;;  %1385 = vmatpush1.bf16.msra.mxu1 %v2722_v1  ;;  %v2812_v0 = vld [vmem:[%s3992_s1 + $0x3c8] ss:$16 sps:$4 sm:$0xff]   ;;  %v2817_v1 = vld [vmem:[%s3992_s1 + $0x3e4] ss:$16 sps:$4 sm:$0xff]  }
  0x40   :  { %1272 = vmatprep.subr.bf16.mxu0 %v2727_v2  ;;  %1395 = vmatprep.subr.bf16.mxu1 %v2730_v3  ;;  %v2820_v2 = vld [vmem:[%s3992_s1 + $0x3ec] ss:$16 sps:$4 sm:$0xff]   ;;  %v2815_v3 = vld [vmem:[%s3992_s1 + $0x3e0] ss:$16 sps:$4 sm:$0xff]  }
  0x42   :  { %1264 = vmatmul.mubr.bf16.vlgmr.msra.gmra.mrb[0].mxu0 %v2260_v4  ;;  %1387 = vmatmul.mubr.bf16.vlgmr.msra.gmra.mrb[0].mxu1 %v2260_v4  ;;  %v2818_v4 = vld [vmem:[%s3992_s1 + $0x3e8] ss:$16 sps:$4 sm:$0xff]  }
  0x43   :  { %1273 = vmatpush1.bf16.msra.mxu0 %v2725_v5  ;;  %1396 = vmatpush1.bf16.msra.mxu1 %v2728_v6  ;;  %v2825_v5 = vld [vmem:[%s3992_s1 + $0x404] ss:$16 sps:$4 sm:$0xff]   ;;  %v2828_v6 = vld [vmem:[%s3992_s1 + $0x40c] ss:$16 sps:$4 sm:$0xff]  }
  0x44   :  { %1274 = vmatprep.subr.bf16.mxu0 %v2733_v7  ;;  %1397 = vmatprep.subr.bf16.mxu1 %v2736_v8  ;;  %v2262_v7 = vcombine.low %v3369_v29, %v3369_v29  ;;  %v2823_v8 = vld [vmem:[%s3992_s1 + $0x400] ss:$16 sps:$4 sm:$0xff]   ;;  %v2858_v29 = vld [vmem:[%s3992_s1 + $0x4ac] ss:$16 sps:$4 sm:$0xff]  }
  0x45   :  { %1304 = vmatprep.mubr.bf16.mxu0 %v2263_v30  ;;  %1427 = vmatprep.mubr.bf16.mxu1 %v2263_v30  ;;  %v2853_v30 = vld [vmem:[%s3992_s1 + $0x4a0] ss:$16 sps:$4 sm:$0xff]  }
  0x47   :  { %1275 = vmatpush1.bf16.msra.mxu0 %v2731_v9  ;;  %1398 = vmatpush1.bf16.msra.mxu1 %v2734_v10  ;;  %v2826_v9 = vld [vmem:[%s3992_s1 + $0x408] ss:$16 sps:$4 sm:$0xff]   ;;  %v2831_v10 = vld [vmem:[%s3992_s1 + $0x424] ss:$16 sps:$4 sm:$0xff]  }
  0x48   :  { %1276 = vmatprep.subr.bf16.mxu0 %v2739_v11  ;;  %1399 = vmatprep.subr.bf16.mxu1 %v2742_v12  ;;  %v3507_v11 = vld [vmem:[%s3993_s0 + $0x10] sm:$0xff]  ;;  %v2834_v12 = vld [vmem:[%s3992_s1 + $0x42c] ss:$16 sps:$4 sm:$0xff]  }
  0x4b   :  { %1277 = vmatpush1.bf16.msra.mxu0 %v2737_v13  ;;  %1400 = vmatpush1.bf16.msra.mxu1 %v2740_v14  ;;  %v2265_v13 = vcombine.high %v3507_v11, %v3507_v11  ;;  %v2829_v14 = vld [vmem:[%s3992_s1 + $0x420] ss:$16 sps:$4 sm:$0xff]  }
  0x4c   :  { %1278 = vmatprep.subr.bf16.mxu0 %v2745_v15  ;;  %1401 = vmatprep.subr.bf16.mxu1 %v2748_v16  ;;  %v2832_v15 = vld [vmem:[%s3992_s1 + $0x428] ss:$16 sps:$4 sm:$0xff]   ;;  %v2837_v16 = vld [vmem:[%s3992_s1 + $0x444] ss:$16 sps:$4 sm:$0xff]  }
  0x4f   :  { %1279 = vmatpush1.bf16.msra.mxu0 %v2743_v17  ;;  %1402 = vmatpush1.bf16.msra.mxu1 %v2746_v18  ;;  %v2840_v17 = vld [vmem:[%s3992_s1 + $0x44c] ss:$16 sps:$4 sm:$0xff]   ;;  %v2835_v18 = vld [vmem:[%s3992_s1 + $0x440] ss:$16 sps:$4 sm:$0xff]  }
  0x50   :  { %1280 = vmatprep.subr.bf16.mxu0 %v2751_v19  ;;  %1403 = vmatprep.subr.bf16.mxu1 %v2754_v20  ;;  %v2838_v19 = vld [vmem:[%s3992_s1 + $0x448] ss:$16 sps:$4 sm:$0xff]   ;;  %v2843_v20 = vld [vmem:[%s3992_s1 + $0x464] ss:$16 sps:$4 sm:$0xff]  }
  0x53   :  { %1281 = vmatpush1.bf16.msra.mxu0 %v2749_v21  ;;  %1404 = vmatpush1.bf16.msra.mxu1 %v2752_v22  ;;  %v2846_v21 = vld [vmem:[%s3992_s1 + $0x46c] ss:$16 sps:$4 sm:$0xff]   ;;  %v2841_v22 = vld [vmem:[%s3992_s1 + $0x460] ss:$16 sps:$4 sm:$0xff]  }
  0x54   :  { %1282 = vmatprep.subr.bf16.mxu0 %v2757_v23  ;;  %1405 = vmatprep.subr.bf16.mxu1 %v2760_v24  ;;  %v2844_v23 = vld [vmem:[%s3992_s1 + $0x468] ss:$16 sps:$4 sm:$0xff]   ;;  %v2849_v24 = vld [vmem:[%s3992_s1 + $0x484] ss:$16 sps:$4 sm:$0xff]  }
  0x57   :  { %1283 = vmatpush1.bf16.msra.mxu0 %v2755_v25  ;;  %1406 = vmatpush1.bf16.msra.mxu1 %v2758_v26  ;;  %v2852_v25 = vld [vmem:[%s3992_s1 + $0x48c] ss:$16 sps:$4 sm:$0xff]   ;;  %v2847_v26 = vld [vmem:[%s3992_s1 + $0x480] ss:$16 sps:$4 sm:$0xff]  }
  0x58   :  { %1284 = vmatprep.subr.bf16.mxu0 %v2763_v27  ;;  %1407 = vmatprep.subr.bf16.mxu1 %v2766_v28  ;;  %v2850_v27 = vld [vmem:[%s3992_s1 + $0x488] ss:$16 sps:$4 sm:$0xff]   ;;  %v2855_v28 = vld [vmem:[%s3992_s1 + $0x4a4] ss:$16 sps:$4 sm:$0xff]  }
  0x5b   :  { %1285 = vmatpush1.bf16.msra.mxu0 %v2761_v31  ;;  %1408 = vmatpush1.bf16.msra.mxu1 %v2764_v32  ;;  %v2856_v31 = vld [vmem:[%s3992_s1 + $0x4a8] ss:$16 sps:$4 sm:$0xff]   ;;  %v2861_v32 = vld [vmem:[%s3992_s1 + $0x4c4] ss:$16 sps:$4 sm:$0xff]  }
  0x5c   :  { %1286 = vmatprep.subr.bf16.mxu0 %v2769_v33  ;;  %1409 = vmatprep.subr.bf16.mxu1 %v2772_v34  ;;  %v2864_v33 = vld [vmem:[%s3992_s1 + $0x4cc] ss:$16 sps:$4 sm:$0xff]   ;;  %v2859_v34 = vld [vmem:[%s3992_s1 + $0x4c0] ss:$16 sps:$4 sm:$0xff]  }
  0x5f   :  { %1287 = vmatpush1.bf16.msra.mxu0 %v2767_v35  ;;  %1410 = vmatpush1.bf16.msra.mxu1 %v2770_v36  ;;  %v2862_v35 = vld [vmem:[%s3992_s1 + $0x4c8] ss:$16 sps:$4 sm:$0xff]   ;;  %v2867_v36 = vld [vmem:[%s3992_s1 + $0x4e4] ss:$16 sps:$4 sm:$0xff]  }
  0x60   :  { %1288 = vmatprep.subr.bf16.mxu0 %v2775_v37  ;;  %1411 = vmatprep.subr.bf16.mxu1 %v2778_v38  ;;  %v2870_v37 = vld [vmem:[%s3992_s1 + $0x4ec] ss:$16 sps:$4 sm:$0xff]   ;;  %v2865_v38 = vld [vmem:[%s3992_s1 + $0x4e0] ss:$16 sps:$4 sm:$0xff]  }
  0x63   :  { %1289 = vmatpush1.bf16.msra.mxu0 %v2773_v39  ;;  %1412 = vmatpush1.bf16.msra.mxu1 %v2776_v40  ;;  %v2868_v39 = vld [vmem:[%s3992_s1 + $0x4e8] ss:$16 sps:$4 sm:$0xff]   ;;  %v2873_v40 = vld [vmem:[%s3992_s1 + $0x504] ss:$16 sps:$4 sm:$0xff]  }
  0x64   :  { %1290 = vmatprep.subr.bf16.mxu0 %v2781_v41  ;;  %1413 = vmatprep.subr.bf16.mxu1 %v2784_v42  ;;  %v2876_v41 = vld [vmem:[%s3992_s1 + $0x50c] ss:$16 sps:$4 sm:$0xff]   ;;  %v2871_v42 = vld [vmem:[%s3992_s1 + $0x500] ss:$16 sps:$4 sm:$0xff]  }
  0x67   :  { %1291 = vmatpush1.bf16.msra.mxu0 %v2779_v43  ;;  %1414 = vmatpush1.bf16.msra.mxu1 %v2782_v44  ;;  %v2874_v43 = vld [vmem:[%s3992_s1 + $0x508] ss:$16 sps:$4 sm:$0xff]   ;;  %v2879_v44 = vld [vmem:[%s3992_s1 + $0x524] ss:$16 sps:$4 sm:$0xff]  }
  0x68   :  { %1292 = vmatprep.subr.bf16.mxu0 %v2787_v45  ;;  %1415 = vmatprep.subr.bf16.mxu1 %v2790_v46  ;;  %v2882_v45 = vld [vmem:[%s3992_s1 + $0x52c] ss:$16 sps:$4 sm:$0xff]   ;;  %v2877_v46 = vld [vmem:[%s3992_s1 + $0x520] ss:$16 sps:$4 sm:$0xff]  }
  0x6b   :  { %1293 = vmatpush1.bf16.msra.mxu0 %v2785_v47  ;;  %1416 = vmatpush1.bf16.msra.mxu1 %v2788_v48  ;;  %v2880_v47 = vld [vmem:[%s3992_s1 + $0x528] ss:$16 sps:$4 sm:$0xff]   ;;  %v2885_v48 = vld [vmem:[%s3992_s1 + $0x544] ss:$16 sps:$4 sm:$0xff]  }
  0x6c   :  { %1294 = vmatprep.subr.bf16.mxu0 %v2793_v49  ;;  %1417 = vmatprep.subr.bf16.mxu1 %v2796_v50  ;;  %v2888_v49 = vld [vmem:[%s3992_s1 + $0x54c] ss:$16 sps:$4 sm:$0xff]   ;;  %v2883_v50 = vld [vmem:[%s3992_s1 + $0x540] ss:$16 sps:$4 sm:$0xff]  }
  0x6f   :  { %1295 = vmatpush1.bf16.msra.mxu0 %v2791_v51  ;;  %1418 = vmatpush1.bf16.msra.mxu1 %v2794_v52  ;;  %v2886_v51 = vld [vmem:[%s3992_s1 + $0x548] ss:$16 sps:$4 sm:$0xff]   ;;  %v2891_v52 = vld [vmem:[%s3992_s1 + $0x564] ss:$16 sps:$4 sm:$0xff]  }
  0x70   :  { %1296 = vmatprep.subr.bf16.mxu0 %v2799_v53  ;;  %1419 = vmatprep.subr.bf16.mxu1 %v2802_v54  ;;  %v2894_v53 = vld [vmem:[%s3992_s1 + $0x56c] ss:$16 sps:$4 sm:$0xff]   ;;  %v2889_v54 = vld [vmem:[%s3992_s1 + $0x560] ss:$16 sps:$4 sm:$0xff]  }
  0x73   :  { %1297 = vmatpush1.bf16.msra.mxu0 %v2797_v55  ;;  %1420 = vmatpush1.bf16.msra.mxu1 %v2800_v56  ;;  %v2892_v55 = vld [vmem:[%s3992_s1 + $0x568] ss:$16 sps:$4 sm:$0xff]   ;;  %v2897_v56 = vld [vmem:[%s3992_s1 + $0x584] ss:$16 sps:$4 sm:$0xff]  }
  0x74   :  { %1298 = vmatprep.subr.bf16.mxu0 %v2805_v57  ;;  %1421 = vmatprep.subr.bf16.mxu1 %v2808_v58  ;;  %v2900_v57 = vld [vmem:[%s3992_s1 + $0x58c] ss:$16 sps:$4 sm:$0xff]   ;;  %v2895_v58 = vld [vmem:[%s3992_s1 + $0x580] ss:$16 sps:$4 sm:$0xff]  }
  0x77   :  { %1299 = vmatpush1.bf16.msra.mxu0 %v2803_v59  ;;  %1422 = vmatpush1.bf16.msra.mxu1 %v2806_v60  ;;  %v2898_v59 = vld [vmem:[%s3992_s1 + $0x588] ss:$16 sps:$4 sm:$0xff]   ;;  %v2903_v60 = vld [vmem:[%s3992_s1 + $0x5a4] ss:$16 sps:$4 sm:$0xff]  }
  0x78   :  { %1300 = vmatprep.subr.bf16.mxu0 %v2811_v61  ;;  %1423 = vmatprep.subr.bf16.mxu1 %v2814_v62  ;;  %v2906_v61 = vld [vmem:[%s3992_s1 + $0x5ac] ss:$16 sps:$4 sm:$0xff]   ;;  %v2901_v62 = vld [vmem:[%s3992_s1 + $0x5a0] ss:$16 sps:$4 sm:$0xff]  }
  0x7b   :  { %1301 = vmatpush1.bf16.msra.mxu0 %v2809_v63  ;;  %1424 = vmatpush1.bf16.msra.mxu1 %v2812_v0  ;;  %v2904_v63 = vld [vmem:[%s3992_s1 + $0x5a8] ss:$16 sps:$4 sm:$0xff]   ;;  %v2909_v0 = vld [vmem:[%s3992_s1 + $0x5c4] ss:$16 sps:$4 sm:$0xff]  }
  0x7c   :  { %1302 = vmatprep.subr.bf16.mxu0 %v2817_v1  ;;  %1425 = vmatprep.subr.bf16.mxu1 %v2820_v2  ;;  %v2912_v1 = vld [vmem:[%s3992_s1 + $0x5cc] ss:$16 sps:$4 sm:$0xff]   ;;  %v2907_v2 = vld [vmem:[%s3992_s1 + $0x5c0] ss:$16 sps:$4 sm:$0xff]  }
  0x7f   :  { %1303 = vmatpush1.bf16.msra.mxu0 %v2815_v3  ;;  %1426 = vmatpush1.bf16.msra.mxu1 %v2818_v4  ;;  %v2910_v3 = vld [vmem:[%s3992_s1 + $0x5c8] ss:$16 sps:$4 sm:$0xff]   ;;  %v2915_v4 = vld [vmem:[%s3992_s1 + $0x5e4] ss:$16 sps:$4 sm:$0xff]  }
  0x80   :  { %1313 = vmatprep.subr.bf16.mxu0 %v2825_v5  ;;  %1436 = vmatprep.subr.bf16.mxu1 %v2828_v6  ;;  %v2918_v5 = vld [vmem:[%s3992_s1 + $0x5ec] ss:$16 sps:$4 sm:$0xff]   ;;  %v2913_v6 = vld [vmem:[%s3992_s1 + $0x5e0] ss:$16 sps:$4 sm:$0xff]  }
  0x82   :  { %1305 = vmatmul.mubr.bf16.vlgmr.msra.gmra.mrb[0].mxu0 %v2262_v7  ;;  %1428 = vmatmul.mubr.bf16.vlgmr.msra.gmra.mrb[0].mxu1 %v2262_v7  ;;  %v2916_v7 = vld [vmem:[%s3992_s1 + $0x5e8] ss:$16 sps:$4 sm:$0xff]  }
  0x83   :  { %1314 = vmatpush1.bf16.msra.mxu0 %v2823_v8  ;;  %1437 = vmatpush1.bf16.msra.mxu1 %v2826_v9  ;;  %v2923_v8 = vld [vmem:[%s3994_s3 + $0x4] ss:$8 sps:$4 sm:$0xff]   ;;  %v2264_v9 = vcombine.low %v3507_v11, %v3507_v11 }
  0x84   :  { %1315 = vmatprep.subr.bf16.mxu0 %v2831_v10  ;;  %1438 = vmatprep.subr.bf16.mxu1 %v2834_v12  ;;  %v2921_v10 = vld [vmem:[%s3994_s3] ss:$8 sps:$4 sm:$0xff]   ;;  %v2926_v12 = vld [vmem:[%s3994_s3 + $0x14] ss:$8 sps:$4 sm:$0xff]   ;;  %v2929_v11 = vld [vmem:[%s3994_s3 + $0x24] ss:$8 sps:$4 sm:$0xff]  }
  0x85   :  { %1345 = vmatprep.mubr.bf16.mxu0 %v2265_v13  ;;  %1468 = vmatprep.mubr.bf16.mxu1 %v2265_v13  ;;  %v2924_v13 = vld [vmem:[%s3994_s3 + $0x10] ss:$8 sps:$4 sm:$0xff]  }
  0x87   :  { %1316 = vmatpush1.bf16.msra.mxu0 %v2829_v14  ;;  %1439 = vmatpush1.bf16.msra.mxu1 %v2832_v15  ;;  %v2927_v14 = vld [vmem:[%s3994_s3 + $0x20] ss:$8 sps:$4 sm:$0xff]   ;;  %v2932_v15 = vld [vmem:[%s3994_s3 + $0x34] ss:$8 sps:$4 sm:$0xff]  }
  0x88   :  { %1317 = vmatprep.subr.bf16.mxu0 %v2837_v16  ;;  %1440 = vmatprep.subr.bf16.mxu1 %v2840_v17  ;;  %v2930_v16 = vld [vmem:[%s3994_s3 + $0x30] ss:$8 sps:$4 sm:$0xff]   ;;  %v2935_v17 = vld [vmem:[%s3994_s3 + $0x44] ss:$8 sps:$4 sm:$0xff]  }
  0x8b   :  { %1318 = vmatpush1.bf16.msra.mxu0 %v2835_v18  ;;  %1441 = vmatpush1.bf16.msra.mxu1 %v2838_v19  ;;  %v2933_v18 = vld [vmem:[%s3994_s3 + $0x40] ss:$8 sps:$4 sm:$0xff]   ;;  %v2938_v19 = vld [vmem:[%s3994_s3 + $0x54] ss:$8 sps:$4 sm:$0xff]  }
  0x8c   :  { %1319 = vmatprep.subr.bf16.mxu0 %v2843_v20  ;;  %1442 = vmatprep.subr.bf16.mxu1 %v2846_v21  ;;  %v2936_v20 = vld [vmem:[%s3994_s3 + $0x50] ss:$8 sps:$4 sm:$0xff]   ;;  %v2941_v21 = vld [vmem:[%s3994_s3 + $0x64] ss:$8 sps:$4 sm:$0xff]  }
  0x8f   :  { %1320 = vmatpush1.bf16.msra.mxu0 %v2841_v22  ;;  %1443 = vmatpush1.bf16.msra.mxu1 %v2844_v23  ;;  %v2939_v22 = vld [vmem:[%s3994_s3 + $0x60] ss:$8 sps:$4 sm:$0xff]   ;;  %v2944_v23 = vld [vmem:[%s3994_s3 + $0x74] ss:$8 sps:$4 sm:$0xff]  }
  0x90   :  { %1321 = vmatprep.subr.bf16.mxu0 %v2849_v24  ;;  %1444 = vmatprep.subr.bf16.mxu1 %v2852_v25  ;;  %v2942_v24 = vld [vmem:[%s3994_s3 + $0x70] ss:$8 sps:$4 sm:$0xff]   ;;  %v2947_v25 = vld [vmem:[%s3994_s3 + $0x84] ss:$8 sps:$4 sm:$0xff]  }
  0x93   :  { %1322 = vmatpush1.bf16.msra.mxu0 %v2847_v26  ;;  %1445 = vmatpush1.bf16.msra.mxu1 %v2850_v27  ;;  %v2945_v26 = vld [vmem:[%s3994_s3 + $0x80] ss:$8 sps:$4 sm:$0xff]   ;;  %v2950_v27 = vld [vmem:[%s3994_s3 + $0x94] ss:$8 sps:$4 sm:$0xff]  }
  0x94   :  { %1323 = vmatprep.subr.bf16.mxu0 %v2855_v28  ;;  %1446 = vmatprep.subr.bf16.mxu1 %v2858_v29  ;;  %v2948_v28 = vld [vmem:[%s3994_s3 + $0x90] ss:$8 sps:$4 sm:$0xff]   ;;  %v2953_v29 = vld [vmem:[%s3994_s3 + $0xa4] ss:$8 sps:$4 sm:$0xff]  }
  0x97   :  { %1324 = vmatpush1.bf16.msra.mxu0 %v2853_v30  ;;  %1447 = vmatpush1.bf16.msra.mxu1 %v2856_v31  ;;  %v2951_v30 = vld [vmem:[%s3994_s3 + $0xa0] ss:$8 sps:$4 sm:$0xff]   ;;  %v2956_v31 = vld [vmem:[%s3994_s3 + $0xb4] ss:$8 sps:$4 sm:$0xff]  }
  0x98   :  { %1325 = vmatprep.subr.bf16.mxu0 %v2861_v32  ;;  %1448 = vmatprep.subr.bf16.mxu1 %v2864_v33  ;;  %v2954_v32 = vld [vmem:[%s3994_s3 + $0xb0] ss:$8 sps:$4 sm:$0xff]   ;;  %v2959_v33 = vld [vmem:[%s3994_s3 + $0xc4] ss:$8 sps:$4 sm:$0xff]  }
  0x9b   :  { %1326 = vmatpush1.bf16.msra.mxu0 %v2859_v34  ;;  %1449 = vmatpush1.bf16.msra.mxu1 %v2862_v35  ;;  %v2957_v34 = vld [vmem:[%s3994_s3 + $0xc0] ss:$8 sps:$4 sm:$0xff]   ;;  %v2962_v35 = vld [vmem:[%s3994_s3 + $0xd4] ss:$8 sps:$4 sm:$0xff]  }
  0x9c   :  { %1327 = vmatprep.subr.bf16.mxu0 %v2867_v36  ;;  %1450 = vmatprep.subr.bf16.mxu1 %v2870_v37  ;;  %v2960_v36 = vld [vmem:[%s3994_s3 + $0xd0] ss:$8 sps:$4 sm:$0xff]   ;;  %v2965_v37 = vld [vmem:[%s3994_s3 + $0xe4] ss:$8 sps:$4 sm:$0xff]  }
  0x9f   :  { %1328 = vmatpush1.bf16.msra.mxu0 %v2865_v38  ;;  %1451 = vmatpush1.bf16.msra.mxu1 %v2868_v39  ;;  %v2963_v38 = vld [vmem:[%s3994_s3 + $0xe0] ss:$8 sps:$4 sm:$0xff]   ;;  %v2968_v39 = vld [vmem:[%s3994_s3 + $0xf4] ss:$8 sps:$4 sm:$0xff]  }
  0xa0   :  { %1329 = vmatprep.subr.bf16.mxu0 %v2873_v40  ;;  %1452 = vmatprep.subr.bf16.mxu1 %v2876_v41  ;;  %v2966_v40 = vld [vmem:[%s3994_s3 + $0xf0] ss:$8 sps:$4 sm:$0xff]   ;;  %v2971_v41 = vld [vmem:[%s3994_s3 + $0x104] ss:$8 sps:$4 sm:$0xff]  }
  0xa3   :  { %1330 = vmatpush1.bf16.msra.mxu0 %v2871_v42  ;;  %1453 = vmatpush1.bf16.msra.mxu1 %v2874_v43  ;;  %v3017_v42 = vld [vmem:[%s3995_s5 + $0x40] sm:$0xff]  }
  0xa4   :  { %1331 = vmatprep.subr.bf16.mxu0 %v2879_v44  ;;  %1454 = vmatprep.subr.bf16.mxu1 %v2882_v45  ;;  %v3018_v43 = vld [vmem:[%s3995_s5] sm:$0xff]   ;;  %v3019_v44 = vld [vmem:[%s3995_s5 + $0x48] sm:$0xff]  }
  0xa5   :  { %v3020_v45 = vld [vmem:[%s3995_s5 + $0x8] sm:$0xff]  }
  0xa7   :  { %1332 = vmatpush1.bf16.msra.mxu0 %v2877_v46  ;;  %1455 = vmatpush1.bf16.msra.mxu1 %v2880_v47  ;;  %v3021_v46 = vld [vmem:[%s3995_s5 + $0x50] sm:$0xff]  }
  0xa8   :  { %1333 = vmatprep.subr.bf16.mxu0 %v2885_v48  ;;  %1456 = vmatprep.subr.bf16.mxu1 %v2888_v49  ;;  %v3022_v47 = vld [vmem:[%s3995_s5 + $0x10] sm:$0xff]   ;;  %v3023_v48 = vld [vmem:[%s3995_s5 + $0x58] sm:$0xff]  }
  0xa9   :  { %v3024_v49 = vld [vmem:[%s3995_s5 + $0x18] sm:$0xff]  }
  0xab   :  { %1334 = vmatpush1.bf16.msra.mxu0 %v2883_v50  ;;  %1457 = vmatpush1.bf16.msra.mxu1 %v2886_v51  ;;  %v3025_v50 = vld [vmem:[%s3995_s5 + $0x60] sm:$0xff]  }
  0xac   :  { %1335 = vmatprep.subr.bf16.mxu0 %v2891_v52  ;;  %1458 = vmatprep.subr.bf16.mxu1 %v2894_v53  ;;  %v3026_v51 = vld [vmem:[%s3995_s5 + $0x20] sm:$0xff]   ;;  %v3027_v52 = vld [vmem:[%s3995_s5 + $0x68] sm:$0xff]  }
  0xad   :  { %v3028_v53 = vld [vmem:[%s3995_s5 + $0x28] sm:$0xff]  }
  0xaf   :  { %1336 = vmatpush1.bf16.msra.mxu0 %v2889_v54  ;;  %1459 = vmatpush1.bf16.msra.mxu1 %v2892_v55  ;;  %v230_v54 = vlaneseq }
  0xb0   :  { %1337 = vmatprep.subr.bf16.mxu0 %v2897_v56  ;;  %1460 = vmatprep.subr.bf16.mxu1 %v2900_v57  ;;  %v3831_v57 = vld [vmem:[%s3996_s2] sm:$0xf] }
  0xb1   :  { %v3825_v55 = vshrl.u32 %v230_v54, 7  ;;  %v3031_v54 = vld [vmem:[%s3995_s5 + $0x78] sm:$0xff]  }
  0xb3   :  { %1338 = vmatpush1.bf16.msra.mxu0 %v2895_v58  ;;  %1461 = vmatpush1.bf16.msra.mxu1 %v2898_v59  ;;  %v232_v56 = vsub.s32 0, %v3825_v55  ;;  %v236_v58 = vsub.s32 1, %v3825_v55  ;;  %v244_v59 = vsub.s32 3, %v3825_v55 }
  0xb4   :  { %1339 = vmatprep.subr.bf16.mxu0 %v2903_v60  ;;  %1462 = vmatprep.subr.bf16.mxu1 %v2906_v61 }
  0xb5   :  { %v233_v60 = vrot.slane %v3831_v57, %v232_v56  ;;  %v237_v61 = vrot.slane %v3831_v57, %v236_v58 }
  0xb7   :  { %1340 = vmatpush1.bf16.msra.mxu0 %v2901_v62  ;;  %1463 = vmatpush1.bf16.msra.mxu1 %v2904_v63  ;;  %v245_v62 = vrot.slane %v3831_v57, %v244_v59  ;;  %v3041_v59 = vmov 0.0  }
  0xb8   :  { %1341 = vmatprep.subr.bf16.mxu0 %v2909_v0  ;;  %1464 = vmatprep.subr.bf16.mxu1 %v2912_v1 }
  0xbb   :  { %1342 = vmatpush1.bf16.msra.mxu0 %v2907_v2  ;;  %1465 = vmatpush1.bf16.msra.mxu1 %v2910_v3 }
  0xbc   :  { %1343 = vmatprep.subr.bf16.mxu0 %v2915_v4  ;;  %1466 = vmatprep.subr.bf16.mxu1 %v2918_v5 }
  0xbf   :  { %1344 = vmatpush1.bf16.msra.mxu0 %v2913_v6  ;;  %1467 = vmatpush1.bf16.msra.mxu1 %v2916_v7 }
  0xc0   :  { %1881 = vmatprep.subr.bf16.mxu0 %v2923_v8  ;;  %2548 = vmatprep.subr.bf16.mxu1 %v3017_v42  ;;  %v3010_v42 = vld [vmem:[%s3994_s3 + $0x1d4] ss:$8 sps:$4 sm:$0xff]  }
  0xc2   :  { %1346 = vmatmul.mubr.bf16.vlgmr.msra.gmra.mrb[0].mxu0 %v2264_v9  ;;  %1469 = vmatmul.mubr.bf16.vlgmr.msra.gmra.mrb[0].mxu1 %v2264_v9 }
  0xc3   :  { %1882 = vmatpush1.bf16.msra.mxu0 %v2921_v10  ;;  %2549 = vmatpush3.bf16.msra.mxu1 %v3018_v43  ;;  %v3008_v43 = vld [vmem:[%s3994_s3 + $0x1d0] ss:$8 sps:$4 sm:$0xff]  }
  0xc4   :  { %1883 = vmatprep.subr.bf16.mxu0 %v2926_v12  ;;  %2550 = vmatprep.subr.bf16.mxu1 %v3019_v44 }
  0xc7   :  { %1884 = vmatpush1.bf16.msra.mxu0 %v2924_v13  ;;  %2551 = vmatpush3.bf16.msra.mxu1 %v3020_v45  ;;  %v3013_v45 = vld [vmem:[%s3994_s3 + $0x1e4] ss:$8 sps:$4 sm:$0xff]  }
  0xc8   :  { %1885 = vmatprep.subr.bf16.mxu0 %v2929_v11  ;;  %2552 = vmatprep.subr.bf16.mxu1 %v3021_v46  ;;  %v3011_v46 = vld [vmem:[%s3994_s3 + $0x1e0] ss:$8 sps:$4 sm:$0xff]  }
  0xcb   :  { %1886 = vmatpush1.bf16.msra.mxu0 %v2927_v14  ;;  %2553 = vmatpush3.bf16.msra.mxu1 %v3022_v47  ;;  %v2969_v14 = vld [vmem:[%s3994_s3 + $0x100] ss:$8 sps:$4 sm:$0xff]  }
  0xcc   :  { %1887 = vmatprep.subr.bf16.mxu0 %v2932_v15  ;;  %2554 = vmatprep.subr.bf16.mxu1 %v3023_v48  ;;  %v3016_v48 = vld [vmem:[%s3994_s3 + $0x1f4] ss:$8 sps:$4 sm:$0xff]  }
  0xcf   :  { %1888 = vmatpush1.bf16.msra.mxu0 %v2930_v16  ;;  %2555 = vmatpush3.bf16.msra.mxu1 %v3024_v49  ;;  %v2974_v16 = vld [vmem:[%s3994_s3 + $0x114] ss:$8 sps:$4 sm:$0xff]   ;;  %v3014_v49 = vld [vmem:[%s3994_s3 + $0x1f0] ss:$8 sps:$4 sm:$0xff]  }
  0xd0   :  { %1889 = vmatprep.subr.bf16.mxu0 %v2935_v17  ;;  %2556 = vmatprep.subr.bf16.mxu1 %v3025_v50 }
  0xd3   :  { %1890 = vmatpush1.bf16.msra.mxu0 %v2933_v18  ;;  %2557 = vmatpush3.bf16.msra.mxu1 %v3026_v51  ;;  %v2972_v18 = vld [vmem:[%s3994_s3 + $0x110] ss:$8 sps:$4 sm:$0xff]  }
  0xd4   :  { %1891 = vmatprep.subr.bf16.mxu0 %v2938_v19  ;;  %2558 = vmatprep.subr.bf16.mxu1 %v3027_v52  ;;  %v2977_v19 = vld [vmem:[%s3994_s3 + $0x124] ss:$8 sps:$4 sm:$0xff]   ;;  %v3029_v52 = vld [vmem:[%s3995_s5 + $0x70] sm:$0xff]  }
  0xd7   :  { %1892 = vmatpush1.bf16.msra.mxu0 %v2936_v20  ;;  %2559 = vmatpush3.bf16.msra.mxu1 %v3028_v53  ;;  %v2975_v20 = vld [vmem:[%s3994_s3 + $0x120] ss:$8 sps:$4 sm:$0xff]   ;;  %v3030_v53 = vld [vmem:[%s3995_s5 + $0x30] sm:$0xff]  }
  0xd8   :  { %1893 = vmatprep.subr.bf16.mxu0 %v2941_v21  ;;  %v2980_v21 = vld [vmem:[%s3994_s3 + $0x134] ss:$8 sps:$4 sm:$0xff]   ;;  %2560 = vmatprep.subr.bf16.mxu1 %v3029_v52 }
  0xdb   :  { %1894 = vmatpush1.bf16.msra.mxu0 %v2939_v22  ;;  %v2978_v22 = vld [vmem:[%s3994_s3 + $0x130] ss:$8 sps:$4 sm:$0xff]   ;;  %2561 = vmatpush3.bf16.msra.mxu1 %v3030_v53 }
  0xdc   :  { %1895 = vmatprep.subr.bf16.mxu0 %v2944_v23  ;;  %v2983_v23 = vld [vmem:[%s3994_s3 + $0x144] ss:$8 sps:$4 sm:$0xff]   ;;  %2562 = vmatprep.subr.bf16.mxu1 %v3031_v54 }
  0xdf   :  { %1896 = vmatpush1.bf16.msra.mxu0 %v2942_v24  ;;  %v2981_v24 = vld [vmem:[%s3994_s3 + $0x140] ss:$8 sps:$4 sm:$0xff]  }
  0xe0   :  { %1897 = vmatprep.subr.bf16.mxu0 %v2947_v25  ;;  %v2986_v25 = vld [vmem:[%s3994_s3 + $0x154] ss:$8 sps:$4 sm:$0xff]  }
  0xe3   :  { %1898 = vmatpush1.bf16.msra.mxu0 %v2945_v26  ;;  %v2984_v26 = vld [vmem:[%s3994_s3 + $0x150] ss:$8 sps:$4 sm:$0xff]  }
  0xe4   :  { %1899 = vmatprep.subr.bf16.mxu0 %v2950_v27  ;;  %v2989_v27 = vld [vmem:[%s3994_s3 + $0x164] ss:$8 sps:$4 sm:$0xff]  }
  0xe7   :  { %1900 = vmatpush1.bf16.msra.mxu0 %v2948_v28  ;;  %v2987_v28 = vld [vmem:[%s3994_s3 + $0x160] ss:$8 sps:$4 sm:$0xff]  }
  0xe8   :  { %1901 = vmatprep.subr.bf16.mxu0 %v2953_v29  ;;  %v2992_v29 = vld [vmem:[%s3994_s3 + $0x174] ss:$8 sps:$4 sm:$0xff]  }
  0xeb   :  { %1902 = vmatpush1.bf16.msra.mxu0 %v2951_v30  ;;  %v2990_v30 = vld [vmem:[%s3994_s3 + $0x170] ss:$8 sps:$4 sm:$0xff]  }
  0xec   :  { %1903 = vmatprep.subr.bf16.mxu0 %v2956_v31  ;;  %v2995_v31 = vld [vmem:[%s3994_s3 + $0x184] ss:$8 sps:$4 sm:$0xff]  }
  0xef   :  { %1904 = vmatpush1.bf16.msra.mxu0 %v2954_v32  ;;  %v2993_v32 = vld [vmem:[%s3994_s3 + $0x180] ss:$8 sps:$4 sm:$0xff]  }
  0xf0   :  { %1905 = vmatprep.subr.bf16.mxu0 %v2959_v33  ;;  %v2998_v33 = vld [vmem:[%s3994_s3 + $0x194] ss:$8 sps:$4 sm:$0xff]  }
  0xf3   :  { %1906 = vmatpush1.bf16.msra.mxu0 %v2957_v34  ;;  %v2996_v34 = vld [vmem:[%s3994_s3 + $0x190] ss:$8 sps:$4 sm:$0xff]  }
  0xf4   :  { %1907 = vmatprep.subr.bf16.mxu0 %v2962_v35  ;;  %v3001_v35 = vld [vmem:[%s3994_s3 + $0x1a4] ss:$8 sps:$4 sm:$0xff]  }
  0xf7   :  { %1908 = vmatpush1.bf16.msra.mxu0 %v2960_v36  ;;  %v2999_v36 = vld [vmem:[%s3994_s3 + $0x1a0] ss:$8 sps:$4 sm:$0xff]  }
  0xf8   :  { %1909 = vmatprep.subr.bf16.mxu0 %v2965_v37  ;;  %v3004_v37 = vld [vmem:[%s3994_s3 + $0x1b4] ss:$8 sps:$4 sm:$0xff]  }
  0xfb   :  { %1910 = vmatpush1.bf16.msra.mxu0 %v2963_v38  ;;  %v3002_v38 = vld [vmem:[%s3994_s3 + $0x1b0] ss:$8 sps:$4 sm:$0xff]  }
  0xfc   :  { %1911 = vmatprep.subr.bf16.mxu0 %v2968_v39  ;;  %v3007_v39 = vld [vmem:[%s3994_s3 + $0x1c4] ss:$8 sps:$4 sm:$0xff]  }
  0xff   :  { %1912 = vmatpush1.bf16.msra.mxu0 %v2966_v40  ;;  %v3005_v40 = vld [vmem:[%s3994_s3 + $0x1c0] ss:$8 sps:$4 sm:$0xff]  }
 0x100   :  { %1922 = vmatprep.subr.bf16.mxu0 %v2971_v41  ;;  %v240_v41 = vsub.s32 2, %v3825_v55  ;;  %v3034_v55 = vld [vmem:[%s3997_s7 + $0x8] sm:$0xff]  }
 0x102   :  { %v241_v44 = vrot.slane %v3831_v57, %v240_v41  ;;  %v3032_v57 = vld [vmem:[%s3995_s5 + $0x38] sm:$0xff]  }
 0x103   :  { %2563 = vmatpush3.bf16.msra.mxu1 %v3032_v57 }
 0x104   :  { %2579 = vmatprep.subr.bf16.mxu1 %v3041_v59 }
 0x195   :  { %v1347_v63 = vpop.f32.mrb[0].mxu0  ;;  %v3842_v0 = vpop.f32.mrb[0].mxu1 }
 0x196   :  { %v2599_v1 = vadd.f32 %v1347_v63, %v233_v60  ;;  %v1349_v2 = vpop.f32.mrb[1].mxu0  ;;  %v1472_v3 = vpop.f32.mrb[1].mxu1  ;;  %v2601_v47 = vadd.f32 %v3842_v0, %v241_v44  ;;  %v1549_v60 = vld [vmem:[%s3998_s4] sm:$0x3] }
 0x197   :  { %v2600_v4 = vadd.f32 %v1349_v2, %v237_v61  ;;  %v2602_v5 = vadd.f32 %v1472_v3, %v245_v62  ;;  %v1351_v6 = vpop.f32.mrb[2].mxu0  ;;  %v1474_v7 = vpop.f32.mrb[2].mxu1  ;;  %v1554_v61 = vrot.slane %v1549_v60, %v232_v56  ;;  %v1558_v62 = vrot.slane %v1549_v60, %v236_v58  ;;  %v3035_v56 = vld [vmem:[%s3997_s7 + $0x10] sm:$0xff]   ;;  %v3036_v58 = vld [vmem:[%s3997_s7 + $0x18] sm:$0xff]  }
 0x198   :  { %v1477_v8 = vmax.f32 %v2599_v1, 0.0  ;;  %v1352_v9 = vpop.f32.mrb[3].mxu0  ;;  %v1475_v10 = vpop.f32.mrb[3].mxu1  ;;  %v1479_v50 = vmax.f32 %v2601_v47, 0.0 }
 0x199   :  { %v1478_v12 = vmax.f32 %v2600_v4, 0.0  ;;  %v1480_v13 = vmax.f32 %v2602_v5, 0.0  ;;  %v3037_v10 = vld [vmem:[%s3997_s7 + $0x20] sm:$0xff]  }
 0x19a   :  { %v1481_v15 = vpack.c.bf16 %v1477_v8, %v1477_v8  ;;  %v1483_v51 = vpack.c.bf16 %v1479_v50, %v1479_v50  ;;  %v3033_v8 = vld [vmem:[%s3997_s7] sm:$0xff]  }
 0x19b   :  { %v1482_v11 = vpack.c.bf16 %v1478_v12, %v1478_v12  ;;  %v1484_v17 = vpack.c.bf16 %v1480_v13, %v1480_v13  ;;  %v3038_v12 = vld [vmem:[%s3997_s7 + $0x28] sm:$0xff]   ;;  %v3039_v13 = vld [vmem:[%s3997_s7 + $0x30] sm:$0xff]  }
 0x19d   :  { %1913 = vmatprep.mubr.bf16.mxu0 %v1482_v11  ;;  %v3040_v11 = vld [vmem:[%s3997_s7 + $0x38] sm:$0xff]  }
 0x19e   :  { %1914 = vmatmul.mubr.bf16.vlgmr.msra.gmra.mrb[4].mxu0 %v1481_v15  ;;  %v2522_v15 = vld [vmem:[%s3999_s6] ss:$0 sm:$0xff] }
 0x19f   :  { %1923 = vmatpush1.bf16.msra.mxu0 %v2969_v14  ;;  %1954 = vmatprep.mubr.bf16.mxu0 %v1484_v17 }
 0x1a0   :  { %1924 = vmatprep.subr.bf16.mxu0 %v2974_v16 }
 0x1a3   :  { %1925 = vmatpush1.bf16.msra.mxu0 %v2972_v18 }
 0x1a4   :  { %1926 = vmatprep.subr.bf16.mxu0 %v2977_v19 }
 0x1a7   :  { %1927 = vmatpush1.bf16.msra.mxu0 %v2975_v20 }
 0x1a8   :  { %1928 = vmatprep.subr.bf16.mxu0 %v2980_v21 }
 0x1ab   :  { %1929 = vmatpush1.bf16.msra.mxu0 %v2978_v22 }
 0x1ac   :  { %1930 = vmatprep.subr.bf16.mxu0 %v2983_v23  ;;  %v2539_v23 = vld [vmem:[%s4000_s8] ss:$0 sm:$0xff] }
 0x1af   :  { %1931 = vmatpush1.bf16.msra.mxu0 %v2981_v24 }
 0x1b0   :  { %1932 = vmatprep.subr.bf16.mxu0 %v2986_v25 }
 0x1b3   :  { %1933 = vmatpush1.bf16.msra.mxu0 %v2984_v26 }
 0x1b4   :  { %1934 = vmatprep.subr.bf16.mxu0 %v2989_v27 }
 0x1b7   :  { %1935 = vmatpush1.bf16.msra.mxu0 %v2987_v28 }
 0x1b8   :  { %1936 = vmatprep.subr.bf16.mxu0 %v2992_v29 }
 0x1bb   :  { %1937 = vmatpush1.bf16.msra.mxu0 %v2990_v30 }
 0x1bc   :  { %1938 = vmatprep.subr.bf16.mxu0 %v2995_v31 }
 0x1bf   :  { %1939 = vmatpush1.bf16.msra.mxu0 %v2993_v32 }
 0x1c0   :  { %1940 = vmatprep.subr.bf16.mxu0 %v2998_v33 }
 0x1c3   :  { %1941 = vmatpush1.bf16.msra.mxu0 %v2996_v34 }
 0x1c4   :  { %1942 = vmatprep.subr.bf16.mxu0 %v3001_v35 }
 0x1c7   :  { %1943 = vmatpush1.bf16.msra.mxu0 %v2999_v36 }
 0x1c8   :  { %1944 = vmatprep.subr.bf16.mxu0 %v3004_v37 }
 0x1cb   :  { %1945 = vmatpush1.bf16.msra.mxu0 %v3002_v38 }
 0x1cc   :  { %1946 = vmatprep.subr.bf16.mxu0 %v3007_v39 }
 0x1cf   :  { %1947 = vmatpush1.bf16.msra.mxu0 %v3005_v40 }
 0x1d0   :  { %1948 = vmatprep.subr.bf16.mxu0 %v3010_v42 }
 0x1d3   :  { %1949 = vmatpush1.bf16.msra.mxu0 %v3008_v43 }
 0x1d4   :  { %1950 = vmatprep.subr.bf16.mxu0 %v3013_v45 }
 0x1d7   :  { %1951 = vmatpush1.bf16.msra.mxu0 %v3011_v46 }
 0x1d8   :  { %1952 = vmatprep.subr.bf16.mxu0 %v3016_v48 }
 0x1db   :  { %1953 = vmatpush1.bf16.msra.mxu0 %v3014_v49 }
 0x1de   :  { %1955 = vmatmul.mubr.bf16.vlgmr.msra.gmra.mrb[4].mxu0 %v1483_v51 }
 0x2b1   :  { %v1956_v63 = vpop.f32.mrb[4].mxu0 }
 0x2b2   :  { %v2603_v0 = vadd.f32 %v1956_v63, %v1554_v61  ;;  %v1958_v1 = vpop.f32.mrb[5].mxu0 }
 0x2b3   :  { %v2604_v2 = vadd.f32 %v1958_v1, %v1558_v62  ;;  %v1960_v3 = vpop.f32.mrb[6].mxu0 }
 0x2b4   :  { %v1963_v4 = vmax.f32 %v2603_v0, 0.0  ;;  %v1961_v5 = vpop.f32.mrb[7].mxu0 }
 0x2b5   :  { %v1964_v6 = vmax.f32 %v2604_v2, 0.0 }
 0x2b6   :  { %v1965_v9 = vpack.c.bf16 %v1963_v4, %v1963_v4 }
 0x2b7   :  { %v1966_v7 = vpack.c.bf16 %v1964_v6, %v1964_v6 }
 0x2b9   :  { %2134 = vmatprep.mubr.bf16.mxu1 %v1966_v7 }
 0x2ba   :  { %2135 = vmatmul.mubr.bf16.vlgmr.msra.gmra.mrb[4].mxu1 %v1965_v9 }
 0x2bb   :  { %2580 = vmatpush3.bf16.msra.mxu1 %v3033_v8  ;;  %2595 = vmatprep.mubr.msk.bf16.mxu1 %vm3042_vm0, %v3041_v59 }
 0x2bc   :  { %2581 = vmatprep.subr.bf16.mxu1 %v3041_v59 }
 0x2bf   :  { %2582 = vmatpush3.bf16.msra.mxu1 %v3034_v55 }
 0x2c0   :  { %2583 = vmatprep.subr.bf16.mxu1 %v3041_v59 }
 0x2c3   :  { %2584 = vmatpush3.bf16.msra.mxu1 %v3035_v56 }
 0x2c4   :  { %2585 = vmatprep.subr.bf16.mxu1 %v3041_v59 }
 0x2c7   :  { %2586 = vmatpush3.bf16.msra.mxu1 %v3036_v58 }
 0x2c8   :  { %2587 = vmatprep.subr.bf16.mxu1 %v3041_v59 }
 0x2cb   :  { %2588 = vmatpush3.bf16.msra.mxu1 %v3037_v10 }
 0x2cc   :  { %2589 = vmatprep.subr.bf16.mxu1 %v3041_v59 }
 0x2cf   :  { %2590 = vmatpush3.bf16.msra.mxu1 %v3038_v12 }
 0x2d0   :  { %2591 = vmatprep.subr.bf16.mxu1 %v3041_v59 }
 0x2d3   :  { %2592 = vmatpush3.bf16.msra.mxu1 %v3039_v13 }
 0x2d4   :  { %2593 = vmatprep.subr.bf16.mxu1 %v3041_v59 }
 0x2d7   :  { %2594 = vmatpush3.bf16.msra.mxu1 %v3040_v11 }
 0x38d   :  { %v2564_v14 = vpop.f32.mrb[4].mxu1 }
 0x38e   :  { %v2565_v16 = vpop.f32.mrb[5].mxu1 }
 0x38f   :  { %v2566_v17 = vadd.f32 %v2565_v16, %v2564_v14  ;;  %v2567_v18 = vpop.f32.mrb[6].mxu1 }
 0x390   :  { %v2568_v19 = vpop.f32.mrb[7].mxu1 }
 0x391   :  { %v2137_v20 = vadd.f32 %v2566_v17, %v2522_v15 }
 0x393   :  { %v2142_v21 = vmax.f32 %v2137_v20, 0.0 }
 0x395   :  { %v2143_v22 = vpack.c.bf16 %v2142_v21, %v2142_v21 }
 0x397   :  { %2596 = vmatmul.mubr.bf16.vlgmr.msra.gmra.mrb[8].mxu1 %v2143_v22 }
 0x46a   :  { %v2249_v24 = vpop.f32.mrb[8].mxu1 }
 0x46b   :  { %v2250_v25 = vadd.f32 %v2539_v23, %v2249_v24  ;;  %v2597_v26 = vpop.f32.mrb[9].mxu1 }
 0x46c   :  { %v2252_v27 = vpop.f32.mrb[10].mxu1 }
 0x46d   :  { %2255 = vst [vmem:[%s4001_s9] sm:$0xff] %v2250_v25  ;;  %v2598_v28 = vpop.f32.mrb[11].mxu1 }

</bundles_post_ra>
